<compile_context>
chip_gen: v5e
topology: v5e:2x2
jax: 0.10.0
libtpu: 0.0.40
codegen_flags: <defaults>
</compile_context>

<pallas_src>
import functools

import jax
import jax.numpy as jnp
from jax.experimental import pallas as pl
from jax.experimental.pallas import tpu as pltpu

LANE = 128
SUBLANE = 8
ROW_ALIGN = 32          # sublane alignment safe for f32/bf16/int8 tiling
MAX_BLOCK_ROWS = 2048   # (2048, 128) f32 tile = 1 MiB per input per buffer
NUM_SPLITS = 2          # leading "parallel" grid axis -> both TensorCores on v7x
NEUTRAL_LOGIT = 100.0   # padding logit; with target=1 the focal loss is exactly 0


def _round_up(x, m):
    return ((x + m - 1) // m) * m


def _focal_elementwise(x, y, gamma, alpha):
    """Elementwise focal(BCE-with-logits) in f32. gamma/alpha are static floats."""
    x = x.astype(jnp.float32)
    y = y.astype(jnp.float32)
    e = jnp.exp(-jnp.abs(x))                              # single EUP exp, reused
    bce = jnp.maximum(x, 0.0) - x * y + jnp.log1p(e)      # stable BCE-with-logits
    inv = 1.0 / (1.0 + e)
    p = jnp.where(x >= 0.0, inv, e * inv)                 # sigmoid(x) from shared e
    p_t = y * p + (1.0 - y) * (1.0 - p)
    alpha_factor = y * alpha + (1.0 - y) * (1.0 - alpha)
    t = jnp.maximum(1.0 - p_t, 0.0)
    if gamma == 0.0:
        mod = jnp.ones_like(t)
    elif gamma == 1.0:
        mod = t
    elif gamma == 1.5:
        mod = t * jnp.sqrt(t)                             # avoids exp+log of pow
    elif gamma == 2.0:
        mod = t * t
    else:
        mod = t ** gamma
    return bce * alpha_factor * mod


def _focal_sum_kernel(gamma, alpha, pred_ref, true_ref, out_ref):
    # grid = (split, row_block); the (8,128) output block depends only on
    # `split`, so it stays resident in VMEM across the (arbitrary) reduction
    # axis -> canonical accumulator pattern.
    i = pl.program_id(1)

    @pl.when(i == 0)
    def _():
        out_ref[...] = jnp.zeros_like(out_ref)

    loss = _focal_elementwise(pred_ref[...], true_ref[...], gamma, alpha)
    # Block-local partial reduction: fold the (bm,128) loss tile into one
    # (8,128) vreg-shaped accumulator.  (bm,128)->(bm//8,8,128) keeps native
    # (8,128) tiles, so the reshape is layout-preserving and the axis-0 sum is
    # just bm/8 vector adds.
    out_ref[...] += loss.reshape(-1, SUBLANE, LANE).sum(axis=0)


def _focal_none_kernel(gamma, alpha, pred_ref, true_ref, out_ref):
    out_ref[...] = _focal_elementwise(
        pred_ref[...], true_ref[...], gamma, alpha
    ).astype(out_ref.dtype)


def _pad_and_tile(pred, true, blocks_multiple):
    """Flatten to a lane-dense (rows, 128) slab, padded with loss-neutral values."""
    n = pred.size
    rows = pl.cdiv(n, LANE)
    bm = min(MAX_BLOCK_ROWS, _round_up(rows, ROW_ALIGN))
    blocks = _round_up(pl.cdiv(rows, bm), blocks_multiple)
    rows_padded = blocks * bm
    pad = rows_padded * LANE - n

    flat_p = pred.reshape(-1)   # keep native dtype (bf16 halves HBM traffic)
    flat_t = true.reshape(-1)
    if pad:
        flat_p = jnp.pad(flat_p, (0, pad), constant_values=NEUTRAL_LOGIT)
        flat_t = jnp.pad(flat_t, (0, pad), constant_values=1)
    return (flat_p.reshape(rows_padded, LANE),
            flat_t.reshape(rows_padded, LANE), bm, blocks)


def focal_loss(pred, true, gamma=1.5, alpha=0.25, reduction="mean"):
    """Focal loss over BCE-with-logits. pred/true: same shape (e.g. NCHW)."""
    assert pred.shape == true.shape, (pred.shape, true.shape)
    n = pred.size
    gamma = float(gamma)
    alpha = float(alpha)

    if reduction in ("mean", "sum"):
        p2, t2, bm, blocks = _pad_and_tile(pred, true, NUM_SPLITS)
        blocks_per_split = blocks // NUM_SPLITS
        in_map = lambda s, i: (s * blocks_per_split + i, 0)

        partials = pl.pallas_call(
            functools.partial(_focal_sum_kernel, gamma, alpha),
            out_shape=jax.ShapeDtypeStruct((NUM_SPLITS * SUBLANE, LANE),
                                           jnp.float32),
            grid=(NUM_SPLITS, blocks_per_split),
            in_specs=[
                pl.BlockSpec((bm, LANE), in_map),
                pl.BlockSpec((bm, LANE), in_map),
            ],
            out_specs=pl.BlockSpec((SUBLANE, LANE), lambda s, i: (s, 0)),
            compiler_params=pltpu.CompilerParams(
                dimension_semantics=("parallel", "arbitrary")),
        )(p2, t2)

        total = jnp.sum(partials, dtype=jnp.float32)   # tiny final reduce (8 KiB)
        return total / n if reduction == "mean" else total

    elif reduction == "none":
        p2, t2, bm, blocks = _pad_and_tile(pred, true, 1)
        out_dtype = (pred.dtype if jnp.issubdtype(pred.dtype, jnp.floating)
                     else jnp.float32)
        out = pl.pallas_call(
            functools.partial(_focal_none_kernel, gamma, alpha),
            out_shape=jax.ShapeDtypeStruct((blocks * bm, LANE), out_dtype),
            grid=(blocks,),
            in_specs=[
                pl.BlockSpec((bm, LANE), lambda i: (i, 0)),
                pl.BlockSpec((bm, LANE), lambda i: (i, 0)),
            ],
            out_specs=pl.BlockSpec((bm, LANE), lambda i: (i, 0)),
            compiler_params=pltpu.CompilerParams(
                dimension_semantics=("parallel",)),
        )(p2, t2)
        return out.reshape(-1)[:n].reshape(pred.shape)

    else:
        raise ValueError(f"unknown reduction: {reduction}")


def focal_loss_ref(pred, true, gamma=1.5, alpha=0.25, reduction="mean"):
    """Pure-JAX reference mirroring the PyTorch module."""
    x = pred.astype(jnp.float32)
    y = true.astype(jnp.float32)
    bce = jnp.maximum(x, 0.0) - x * y + jnp.log1p(jnp.exp(-jnp.abs(x)))
    p = jax.nn.sigmoid(x)
    p_t = y * p + (1.0 - y) * (1.0 - p)
    alpha_factor = y * alpha + (1.0 - y) * (1.0 - alpha)
    loss = bce * alpha_factor * (1.0 - p_t) ** gamma
    if reduction == "mean":
        return loss.mean()
    if reduction == "sum":
        return loss.sum()
    return loss


if __name__ == "__main__":
    key = jax.random.PRNGKey(0)
    k1, k2 = jax.random.split(key)
    # NCHW, small shapes: batch=2, channels=4, spatial=16x16
    pred = jax.random.normal(k1, (2, 4, 16, 16), dtype=jnp.float32) * 2.0
    true = (jax.random.uniform(k2, (2, 4, 16, 16)) > 0.7).astype(jnp.float32)

    out_mean = jax.block_until_ready(focal_loss(pred, true, reduction="mean"))
    ref_mean = focal_loss_ref(pred, true, reduction="mean")
    assert jnp.allclose(out_mean, ref_mean, rtol=1e-5, atol=1e-6), (out_mean, ref_mean)

    out_sum = jax.block_until_ready(focal_loss(pred, true, reduction="sum"))
    ref_sum = focal_loss_ref(pred, true, reduction="sum")
    assert jnp.allclose(out_sum, ref_sum, rtol=1e-5, atol=1e-5), (out_sum, ref_sum)

    out_none = jax.block_until_ready(focal_loss(pred, true, reduction="none"))
    ref_none = focal_loss_ref(pred, true, reduction="none")
    assert jnp.allclose(out_none, ref_none, rtol=1e-5, atol=1e-6)

    print("KERNEL_OK")
</pallas_src>

<mosaic_0001>
module attributes {stable_mosaic.version = 11 : i64} {
  func.func @_focal_sum_kernel(%arg0: i32, %arg1: i32, %arg2: memref<32x128xf32, #tpu.memory_space<vmem>>, %arg3: memref<32x128xf32, #tpu.memory_space<vmem>>, %arg4: memref<8x128xf32, #tpu.memory_space<vmem>>) attributes {dimension_semantics = [#tpu.dimension_semantics<parallel>, #tpu.dimension_semantics<arbitrary>], iteration_bounds = array<i64: 2, 1>, scalar_prefetch = 0 : i64, scratch_operands = 0 : i64, tpu.core_type = #tpu.core_type<tc>, window_params = [{transform_indices = @transform_0, window_bounds = array<i64: 32, 128>}, {transform_indices = @transform_1, window_bounds = array<i64: 32, 128>}, {transform_indices = @transform_2, window_bounds = array<i64: 8, 128>}]} {
    %c0_i32 = arith.constant 0 : i32
    %0 = arith.cmpi eq, %arg1, %c0_i32 : i32
    %1 = arith.extui %0 : i1 to i32
    %c0_i32_0 = arith.constant 0 : i32
    %2 = arith.cmpi ne, %1, %c0_i32_0 : i32
    scf.if %2 {
      %cst_20 = arith.constant 0.000000e+00 : f32
      %50 = vector.broadcast %cst_20 : f32 to vector<8x128xf32>
      %c0_21 = arith.constant 0 : index
      %c0_22 = arith.constant 0 : index
      %51 = vector.load %arg4[%c0_21, %c0_22] : memref<8x128xf32, #tpu.memory_space<vmem>>, vector<8x128xf32>
      tpu.vector_store %arg4[%c0_21, %c0_22], %50 {strides = array<i32>} : memref<8x128xf32, #tpu.memory_space<vmem>>, vector<8x128xf32>,
    } else {
    }
    %c0 = arith.constant 0 : index
    %c0_1 = arith.constant 0 : index
    %3 = vector.load %arg2[%c0, %c0_1] : memref<32x128xf32, #tpu.memory_space<vmem>>, vector<32x128xf32>
    %c0_2 = arith.constant 0 : index
    %c0_3 = arith.constant 0 : index
    %4 = vector.load %arg3[%c0_2, %c0_3] : memref<32x128xf32, #tpu.memory_space<vmem>>, vector<32x128xf32>
    %5 = math.absf %3 : vector<32x128xf32>
    %cst = arith.constant 0.000000e+00 : f32
    %6 = vector.broadcast %cst : f32 to vector<32x128xf32>
    %7 = arith.subf %6, %5 : vector<32x128xf32>
    %8 = math.exp %7 : vector<32x128xf32>
    %cst_4 = arith.constant 0.000000e+00 : f32
    %9 = vector.broadcast %cst_4 : f32 to vector<32x128xf32>
    %10 = arith.maximumf %3, %9 : vector<32x128xf32>
    %11 = arith.mulf %3, %4 : vector<32x128xf32>
    %12 = arith.subf %10, %11 : vector<32x128xf32>
    %13 = math.log1p %8 : vector<32x128xf32>
    %14 = arith.addf %12, %13 : vector<32x128xf32>
    %cst_5 = arith.constant 1.000000e+00 : f32
    %15 = vector.broadcast %cst_5 : f32 to vector<32x128xf32>
    %16 = arith.addf %15, %8 : vector<32x128xf32>
    %cst_6 = arith.constant 1.000000e+00 : f32
    %17 = vector.broadcast %cst_6 : f32 to vector<32x128xf32>
    %18 = arith.divf %17, %16 : vector<32x128xf32>
    %cst_7 = arith.constant 0.000000e+00 : f32
    %19 = vector.broadcast %cst_7 : f32 to vector<32x128xf32>
    %20 = arith.cmpf oge, %3, %19 : vector<32x128xf32>
    %21 = arith.mulf %8, %18 : vector<32x128xf32>
    %22 = arith.select %20, %18, %21 : vector<32x128xi1>, vector<32x128xf32>
    %23 = arith.mulf %4, %22 : vector<32x128xf32>
    %cst_8 = arith.constant 1.000000e+00 : f32
    %24 = vector.broadcast %cst_8 : f32 to vector<32x128xf32>
    %25 = arith.subf %24, %4 : vector<32x128xf32>
    %cst_9 = arith.constant 1.000000e+00 : f32
    %26 = vector.broadcast %cst_9 : f32 to vector<32x128xf32>
    %27 = arith.subf %26, %22 : vector<32x128xf32>
    %28 = arith.mulf %25, %27 : vector<32x128xf32>
    %29 = arith.addf %23, %28 : vector<32x128xf32>
    %cst_10 = arith.constant 2.500000e-01 : f32
    %30 = vector.broadcast %cst_10 : f32 to vector<32x128xf32>
    %31 = arith.mulf %4, %30 : vector<32x128xf32>
    %cst_11 = arith.constant 1.000000e+00 : f32
    %32 = vector.broadcast %cst_11 : f32 to vector<32x128xf32>
    %33 = arith.subf %32, %4 : vector<32x128xf32>
    %cst_12 = arith.constant 7.500000e-01 : f32
    %34 = vector.broadcast %cst_12 : f32 to vector<32x128xf32>
    %35 = arith.mulf %33, %34 : vector<32x128xf32>
    %36 = arith.addf %31, %35 : vector<32x128xf32>
    %cst_13 = arith.constant 1.000000e+00 : f32
    %37 = vector.broadcast %cst_13 : f32 to vector<32x128xf32>
    %38 = arith.subf %37, %29 : vector<32x128xf32>
    %cst_14 = arith.constant 0.000000e+00 : f32
    %39 = vector.broadcast %cst_14 : f32 to vector<32x128xf32>
    %40 = arith.maximumf %38, %39 : vector<32x128xf32>
    %41 = math.sqrt %40 : vector<32x128xf32>
    %42 = arith.mulf %40, %41 : vector<32x128xf32>
    %43 = arith.mulf %14, %36 : vector<32x128xf32>
    %44 = arith.mulf %43, %42 : vector<32x128xf32>
    %c0_15 = arith.constant 0 : index
    %c0_16 = arith.constant 0 : index
    %45 = vector.load %arg4[%c0_15, %c0_16] : memref<8x128xf32, #tpu.memory_space<vmem>>, vector<8x128xf32>
    %46 = vector.shape_cast %44 : vector<32x128xf32> to vector<4x8x128xf32>
    %cst_17 = arith.constant dense<0.000000e+00> : vector<8x128xf32>
    %47 = vector.multi_reduction <add>, %46, %cst_17 [0] : vector<4x8x128xf32> to vector<8x128xf32>
    %48 = arith.addf %45, %47 : vector<8x128xf32>
    %c0_18 = arith.constant 0 : index
    %c0_19 = arith.constant 0 : index
    %49 = vector.load %arg4[%c0_18, %c0_19] : memref<8x128xf32, #tpu.memory_space<vmem>>, vector<8x128xf32>
    tpu.vector_store %arg4[%c0_18, %c0_19], %48 {strides = array<i32>} : memref<8x128xf32, #tpu.memory_space<vmem>>, vector<8x128xf32>,
    return
  }
  func.func @transform_0(%arg0: i32, %arg1: i32) -> (i32, i32) {
    %c1_i32 = arith.constant 1 : i32
    %0 = arith.muli %arg0, %c1_i32 : i32
    %1 = arith.addi %0, %arg1 : i32
    %c0_i32 = arith.constant 0 : i32
    %c0_i32_0 = arith.constant 0 : i32
    return %1, %c0_i32 : i32, i32
  }
  func.func @transform_1(%arg0: i32, %arg1: i32) -> (i32, i32) {
    %c1_i32 = arith.constant 1 : i32
    %0 = arith.muli %arg0, %c1_i32 : i32
    %1 = arith.addi %0, %arg1 : i32
    %c0_i32 = arith.constant 0 : i32
    %c0_i32_0 = arith.constant 0 : i32
    return %1, %c0_i32 : i32, i32
  }
  func.func @transform_2(%arg0: i32, %arg1: i32) -> (i32, i32) {
    %c0_i32 = arith.constant 0 : i32
    %c0_i32_0 = arith.constant 0 : i32
    return %arg0, %c0_i32 : i32, i32
  }
}

</mosaic_0001>

<bundles_post_ra>
// kernel: tpu_custom_call.1
= control target key start
LH: loop header
LB: loop body
LE: loop exit
PB: predicated region body
PF: predicated region fallthrough
CT: control target
= control target key end

     0   :  { %7 = vsyncpa [#allocation3], 0  ;;  %s1304_s0 = inlined_call_operand.hbm [shape: f32[64,128], index: 0, kind: input, shape index: {}]   ;;  %s1305_s1 = inlined_call_operand.hbm [shape: f32[64,128], index: 1, kind: input, shape index: {}]   ;;  %s1306_s2 = inlined_call_operand.hbm [shape: f32[16,128], index: 2, kind: output, shape index: {}]  }
   0x1   :  { %9 = vsyncpa [#allocation3 + $0x1], 0 }
   0x2   :  { %10 = vsyncpa [#allocation6], 0 }
   0x3   :  { %12 = vsyncpa [#allocation6 + $0x1], 0 }
   0x4   :  { %13 = vsyncpa [#allocation4], 0 }
   0x5   :  { %15 = vsyncpa [#allocation4 + $0x1], 0  ;;  %s897_s9 = smov 0   ;;  %s899_s10 = smov 0  }
   0x6   :  { %s901_s11 = smov 0   ;;  %s903_s12 = smov 0  }
   0x7   :  { %s905_s13 = smov 0   ;;  %s907_s14 = smov 0  }
   0x8 LB: > { %s610_s15 = sadd.s32 4294967295, %s878_s14   ;;  %s611_s16 = sadd.s32 4294967294, %s878_s14   ;;  %s878_s14 = sphi %s907_s14, %s21_s14   ;;  %s874_s13 = sphi %s905_s13, %s1336_s13   ;;  %s870_s12 = sphi %s903_s12, %s1335_s12   ;;  %s866_s11 = sphi %s901_s11, %s1334_s11   ;;  %s862_s10 = sphi %s899_s10, %s1333_s10   ;;  %s858_s9 = sphi %s897_s9, %s1332_s9  }
   0x9   : > { %s33_s17 = sadd.s32 1, %s874_s13  ;;  %s42_s18 = sadd.s32 1, %s866_s11 }
   0xa   : > { %p35_p0 = scmp.ge.s32.totalorder %s33_s17, 2  ;;  %p49_p1 = scmp.ne.s32.totalorder %s866_s11, %s862_s10 }
   0xb   : > { %p50_p2 = scmp.eq.s32.totalorder %s878_s14, 0  ;;  %p55_p3 = scmp.ne.s32.totalorder %s862_s10, %s858_s9 }
   0xc   : > { %s1338_s17 = smov (%p35_p0, %s33_s17), 0  ;;  %p56_p5 = scmp.eq.s32.totalorder %s610_s15, 0 }
   0xd   : > { %p938_p4 = por %p50_p2, %p49_p1  ;;  %s39_s20 = ssub.s32 %s874_s13, %s1338_s17 }
   0xe   : > { %p107_p6 = scmp.eq.s32.totalorder %s610_s15, 1  ;;  %p40_p7 = scmp.eq.s32.totalorder %s39_s20, 0 }
   0xf   : > { %p944_p8 = por %p56_p5, %p55_p3  ;;  %p113_p10 = scmp.eq.s32.totalorder %s611_s16, 1 }
  0x10   : > { %p948_p9 = por %p107_p6, %p49_p1  ;;  %p613_p12 = scmp.ge.s32.totalorder %s878_s14, 2 }
  0x11   : > { %s953_s23 = scalar_select %p40_p7, %s866_s11, %s42_s18  }
  0x12   : > { %p955_p11 = por %p113_p10, %p55_p3  ;;  %p647_p13 = scmp.lt.s32.totalorder %s878_s14, 2 }
  0x13   : > { %s962_s25 = sand.u32 1, %s866_s11   ;;  %s628_s27 = sshll.u32 %s874_s13, 5 }
  0x14   : > { %s614_s26 = sshll.u32 %s962_s25, 5  ;;  %s143_s30 = scalar_lea.hbm %s1304_s0, %s628_s27 }
  0x15   : > { %s137_s3 = scalar_lea.vmem [#allocation2], %s614_s26  ;;  %s144_s5 = sshll.u32 %s143_s30, 4  ;;  %s145_s5 = int_to_ptr.hbm [resolvable:$true] %s144_s5 }
  0x16   : > { %s146_s4 = sshll.u32 %s137_s3, 4  ;;  %p971_p0 = pnand %p647_p13, %p938_p4  ;;  %s147_s4 = int_to_ptr.vmem [resolvable:$true] %s146_s4 }
  0x17   : > { %p620_p1 = scmp.ge.s32.totalorder %s878_s14, 1  ;;  %s134_s7 = scalar_lea.sflag [#allocation3], %s962_s25 }
  0x18   : > { %s880_s8 = smov 128   ;;  %s881_s15 = smov 8  }
  0x19   : > { %639 = dma.hbm_to_vmem [thread:$0]  (!%p971_p0), %s145_s5, 512, %s147_s4, %s134_s7, %s880_s8, %s880_s8, %s881_s15  }
  0x1a   : > { %p177_p2 = scmp.lt.s32.totalorder %s878_s14, 3  ;;  %s166_s20 = scalar_lea.hbm %s1305_s1, %s628_s27 }
  0x1b   : > { %s167_s28 = sshll.u32 %s166_s20, 4  ;;  %s160_s19 = scalar_lea.vmem [#allocation5], %s614_s26  ;;  %s168_s28 = int_to_ptr.hbm [resolvable:$true] %s167_s28 }
  0x1c   : > { %p178_p3 = pnand %p620_p1, %p177_p2  ;;  %s169_s29 = sshll.u32 %s160_s19, 4  ;;  %s170_s29 = int_to_ptr.vmem [resolvable:$true] %s169_s29 }
  0x1d   : > { %s157_s30 = scalar_lea.sflag [#allocation6], %s962_s25  ;;  %s987_s3 = sand.u32 (!%p178_p3), 1, %s862_s10  }
  0x1e   : > { %642 = dma.hbm_to_vmem [thread:$0]  (!%p971_p0), %s168_s28, 512, %s170_s29, %s157_s30, %s880_s8, %s880_s8, %s881_s15  }
  0x1f   : > { %181 = sbr.rel (%p178_p3) target bundleno = 120 (0x78), region = 28  ;;  %s621_s4 = sshll.u32 (!%p178_p3), %s987_s3, 5 }
  0x20   : > { %s184_s5 = scalar_lea.sflag (!%p178_p3), [#allocation3], %s987_s3  ;;  %s187_s7 = scalar_lea.vmem (!%p178_p3), [#allocation2], %s621_s4 }
  0x24   : > { %845 = dma.done.wait (%p944_p8), %s184_s5, 512  }
  0x25   : > { %847 = vsyncadd (%p944_p8), %s184_s5, 4294966784  ;;  %s194_s25 = scalar_lea.sflag [#allocation6], %s987_s3  ;;  %s996_s26 = scalar_lea.vmem [#allocation5], %s621_s4 }
  0x26   : > { %849 = dma.done.wait (%p944_p8), %s194_s25, 512  }
  0x27   : > { %851 = vsyncadd (%p944_p8), %s194_s25, 4294966784  ;;  %v1002_v0 = vld [vmem:[%s187_s7] sm:$0xff]  ;;  %v1004_v1 = vld [vmem:[%s187_s7 + $0x8] sm:$0xff]  ;;  %s623_s21 = sshll.u32 %s987_s3, 3  ;;  %s625_s27 = sshll.u32 %s870_s12, 3 }
  0x28   : > { %v1006_v2 = vld [vmem:[%s187_s7 + $0x10] sm:$0xff]  ;;  %v1008_v3 = vld [vmem:[%s187_s7 + $0x18] sm:$0xff]  ;;  %v241_v4 = vand.u32 2147483647, %v1002_v0  ;;  %v242_v5 = vand.u32 2147483647, %v1004_v1  ;;  %s502_s15 = scalar_lea.hbm %s1306_s2, %s625_s27 }
  0x29   : > { %v243_v6 = vand.u32 2147483647, %v1006_v2  ;;  %v244_v7 = vand.u32 2147483647, %v1008_v3  ;;  %v1037_v24 = vld [vmem:[%s996_s26] sm:$0xff]  ;;  %v1040_v25 = vld [vmem:[%s996_s26 + $0x8] sm:$0xff] }
  0x2a   : > { %v245_v8 = vsub.f32 0.0, %v241_v4  ;;  %v246_v9 = vsub.f32 0.0, %v242_v5  ;;  %v1044_v26 = vld [vmem:[%s996_s26 + $0x10] sm:$0xff]  ;;  %v257_v27 = vmax.f32 %v1002_v0, 0.0  ;;  %v258_v29 = vmax.f32 %v1004_v1, 0.0  ;;  %s223_s16 = scalar_lea.vmem [#allocation7], %s623_s21 }
  0x2b   : > { %v247_v10 = vsub.f32 0.0, %v243_v6  ;;  %v248_v12 = vsub.f32 0.0, %v244_v7  ;;  %v259_v30 = vmax.f32 %v1006_v2, 0.0  ;;  %v1052_v31 = vmul.f32 %v1037_v24, %v1002_v0  ;;  %s504_s18 = sshll.u32 %s223_s16, 4  ;;  %s506_s20 = sshll.u32 %s502_s15, 4  ;;  %s505_s18 = int_to_ptr.vmem [resolvable:$true] %s504_s18  ;;  %s507_s20 = int_to_ptr.hbm [resolvable:$true] %s506_s20 }
  0x2c   : > { %v249_v11 = vmul.f32 1.442695, %v245_v8  ;;  %v251_v13 = vmul.f32 1.442695, %v246_v9  ;;  %v1056_v32 = vmul.f32 %v1040_v25, %v1004_v1  ;;  %v260_v34 = vmax.f32 %v1008_v3, 0.0  ;;  %s492_s12 = scalar_lea.sflag [#allocation4], %s987_s3 }
  0x2d   : > { %v253_v14 = vmul.f32 1.442695, %v247_v10  ;;  %v255_v15 = vmul.f32 1.442695, %v248_v12  ;;  %v389_v35 = vsub.f32 1.0, %v1037_v24  ;;  %v390_v36 = vsub.f32 1.0, %v1040_v25 }
  0x2e   : > { %700 = vpow2.f32 %v249_v11  ;;  %v391_v41 = vsub.f32 1.0, %v1044_v26  ;;  %vm373_vm2 = vcmp.ge.f32.partialorder %v1002_v0, 0.0  ;;  %vm374_vm4 = vcmp.ge.f32.partialorder %v1004_v1, 0.0  ;;  %s806_s28 = sshra.s32 %s507_s20, 4  ;;  %s812_s4 = scalar_lea.hbm %s1306_s2, 16  ;;  %s807_s28 = int_to_ptr.hbm [resolvable:$true] %s806_s28 }
  0x2f   : > { %702 = vpow2.f32 %v251_v13  ;;  %vm375_vm9 = vcmp.ge.f32.partialorder %v1006_v2, 0.0  ;;  %vm376_vm14 = vcmp.ge.f32.partialorder %v1008_v3, 0.0  ;;  %s808_s19 = scalar_lea.hbm %s807_s28, 8  ;;  %p813_p7 = scmp.lt.s32.totalorder %s807_s28, %s1306_s2 }
  0x30   : > { %704 = vpow2.f32 %v253_v14  ;;  %p809_p4 = scmp.ne.s32.totalorder %s807_s28, %s808_s19  ;;  %p814_p8 = scmp.lt.s32.totalorder %s812_s4, %s808_s19 }
  0x31   : > { %706 = vpow2.f32 %v255_v15 }
  0x32   : > { %p810_p5 = pnand %p809_p4, %p948_p9  ;;  %p815_p10 = por %p814_p8, %p813_p7 }
  0x34   : > { %v1014_v16 = vpop.eup %700  ;;  %p811_p6 = pneg %p810_p5 }
  0x35   : > { %v1016_v17 = vpop.eup %702  ;;  %v1021_v19 = vadd.f32 1.0, %v1014_v16  ;;  %v1067_v42 = vmul.f32 -0.5, %v1014_v16  ;;  %v275_v14 = vand.u32 2147483647, %v1014_v16 }
  0x36   : > { %v1018_v18 = vpop.eup %704  ;;  %v1024_v20 = vadd.f32 1.0, %v1016_v17  ;;  %p816_p13 = pnand %p815_p10, %p811_p6 }
  0x37   : > { %v1026_v21 = vpop.eup %706  ;;  %v1029_v22 = vadd.f32 1.0, %v1018_v18  ;;  %708 = vrcp.f32 %v1021_v19  ;;  %v322_v28 = vand.u32 2147483647, %v1021_v19  ;;  %v324_v39 = vand.u32 2147483648, %v1021_v19 }
  0x38   : > { %710 = vrcp.f32 %v1024_v20  ;;  %v1034_v23 = vadd.f32 1.0, %v1026_v21  ;;  %v337_v40 = vand.u32 2147483647, %v1024_v20  ;;  %vm318_vm0 = vweird.f32 %v1021_v19 }
  0x39   : > { %712 = vrcp.f32 %v1029_v22  ;;  %vm1070_vm1 = vcmp.eq.f32.partialorder %v322_v28, 8.507059e+37  ;;  %v339_v47 = vand.u32 2147483648, %v1024_v20  ;;  %v354_v48 = vand.u32 2147483648, %v1029_v22 }
  0x3a   : > { %714 = vrcp.f32 %v1034_v23  ;;  %vm333_vm5 = vweird.f32 %v1024_v20  ;;  %v325_v52 = vor.u32 1.1754944e-38, %v324_v39  ;;  %vm1081_vm7 = vcmp.eq.f32.partialorder %v337_v40, 8.507059e+37 }
  0x3b   : > { %vm348_vm8 = vweird.f32 %v1029_v22  ;;  %v352_v58 = vand.u32 2147483647, %v1029_v22  ;;  %v340_v61 = vor.u32 1.1754944e-38, %v339_v47  ;;  %v355_v62 = vor.u32 1.1754944e-38, %v354_v48 }
  0x3c   : > { %vm363_vm13 = vweird.f32 %v1034_v23  ;;  %v369_v6 = vand.u32 2147483648, %v1034_v23  ;;  %v367_v10 = vand.u32 2147483647, %v1034_v23  ;;  %716 = vlog2.f32 %v1021_v19 }
  0x3d   : > { %v709_v33 = vpop.eup %708  ;;  %718 = vlog2.f32 %v1024_v20 }
  0x3e   : > { %v711_v37 = vpop.eup %710  ;;  %v314_v38 = vmul.f32 %v709_v33, %v1021_v19  ;;  %vm319_vm3 = vweird.f32 %v709_v33  ;;  %v370_v40 = vor.u32 1.1754944e-38, %v369_v6  ;;  %720 = vlog2.f32 %v1029_v22 }
  0x3f   : > { %v329_v44 = vmul.f32 %v711_v37, %v1024_v20  ;;  %v713_v45 = vpop.eup %712  ;;  %vm334_vm6 = vweird.f32 %v711_v37  ;;  %vm1089_vm10 = vmor %vm318_vm0, %vm319_vm3  ;;  %vm353_vm3 = vcmp.eq.f32.partialorder %v352_v58, 8.507059e+37  ;;  %722 = vlog2.f32 %v1034_v23 }
  0x40   : > { %v315_v46 = vsub.f32 1.0, %v314_v38  ;;  %v344_v50 = vmul.f32 %v713_v45, %v1029_v22  ;;  %v715_v54 = vpop.eup %714  ;;  %vm349_vm11 = vweird.f32 %v713_v45  ;;  %vm1096_vm12 = vmor %vm333_vm5, %vm334_vm6  ;;  %v281_v38 = vmul.f32 -0.5, %v1016_v17 }
  0x41   : > { %v330_v49 = vsub.f32 1.0, %v329_v44  ;;  %v359_v63 = vmul.f32 %v715_v54, %v1034_v23  ;;  %vm1108_vm15 = vmor %vm348_vm8, %vm349_vm11  ;;  %vm364_vm0 = vweird.f32 %v715_v54  ;;  %vm368_vm5 = vcmp.eq.f32.partialorder %v367_v10, 8.507059e+37 }
  0x42   : > { %v316_v51 = vmul.f32 %v709_v33, %v315_v46  ;;  %v345_v57 = vsub.f32 1.0, %v344_v50  ;;  %v299_v6 = vmul.f32 -0.5, %v1026_v21  ;;  %v263_v10 = vmul.f32 %v1044_v26, %v1006_v2 }
  0x43   : > { %v331_v56 = vmul.f32 %v711_v37, %v330_v49  ;;  %v360_v9 = vsub.f32 1.0, %v359_v63 }
  0x44   : > { %v317_v59 = vadd.f32 %v709_v33, %v316_v51  ;;  %v346_v5 = vmul.f32 %v713_v45, %v345_v57  ;;  %v1138_v51 = vld [vmem:[%s996_s26 + $0x18] sm:$0xff] }
  0x45   : > { %v332_v4 = vadd.f32 %v711_v37, %v331_v56  ;;  %v361_v28 = vmul.f32 %v715_v54, %v360_v9  ;;  %v392_v20 = vsub.f32 1.0, %v1138_v51  ;;  %v717_v9 = vpop.eup %716  ;;  %v264_v23 = vmul.f32 %v1138_v51, %v1008_v3 }
  0x46   : > { %v321_v7 = vsel %vm1089_vm10, %v709_v33, %v317_v59  ;;  %v347_v13 = vadd.f32 %v713_v45, %v346_v5 }
  0x47   : > { %v326_v11 = vsel %vm1070_vm1, %v325_v52, %v321_v7  ;;  %v336_v12 = vsel %vm1096_vm12, %v711_v37, %v332_v4  ;;  %vm1126_vm1 = vmor %vm363_vm13, %vm364_vm0  ;;  %v362_v46 = vadd.f32 %v715_v54, %v361_v28  ;;  %v284_v28 = vand.u32 2147483647, %v1016_v17 }
  0x48   : > { %v341_v15 = vsel %vm1081_vm7, %v340_v61, %v336_v12  ;;  %v377_v33 = vmul.f32 %v1014_v16, %v326_v11  ;;  %v351_v39 = vsel %vm1108_vm15, %v713_v45, %v347_v13  ;;  %v290_v61 = vmul.f32 -0.5, %v1018_v18  ;;  %v719_v13 = vpop.eup %718 }
  0x49   : > { %v378_v43 = vmul.f32 %v1016_v17, %v341_v15  ;;  %v356_v44 = vsel %vm353_vm3, %v355_v62, %v351_v39  ;;  %v366_v52 = vsel %vm1126_vm1, %v715_v54, %v362_v46  ;;  %v282_v37 = vadd.f32 1.0, %v281_v38  ;;  %v721_v46 = vpop.eup %720 }
  0x4a   : > { %v381_v47 = vsel %vm373_vm2, %v326_v11, %v377_v33  ;;  %v379_v48 = vmul.f32 %v1018_v18, %v356_v44  ;;  %v371_v56 = vsel %vm368_vm5, %v370_v40, %v366_v52  ;;  %v291_v40 = vadd.f32 1.0, %v290_v61 }
  0x4b   : > { %v382_v45 = vsel %vm374_vm4, %v341_v15, %v378_v43  ;;  %v385_v49 = vmul.f32 %v381_v47, %v1037_v24  ;;  %v393_v50 = vsub.f32 1.0, %v381_v47  ;;  %v380_v59 = vmul.f32 %v1026_v21, %v371_v56 }
  0x4c   : > { %v386_v53 = vmul.f32 %v382_v45, %v1040_v25  ;;  %v394_v55 = vsub.f32 1.0, %v382_v45  ;;  %v383_v57 = vsel %vm375_vm9, %v356_v44, %v379_v48  ;;  %v273_v15 = vadd.f32 1.0, %v1067_v42  ;;  %v723_v42 = vpop.eup %722 }
  0x4d   : > { %v397_v58 = vmul.f32 %v393_v50, %v389_v35  ;;  %v387_v60 = vmul.f32 %v383_v57, %v1044_v26  ;;  %v395_v19 = vsub.f32 1.0, %v383_v57  ;;  %v384_v63 = vsel %vm376_vm14, %v371_v56, %v380_v59 }
  0x4e   : > { %v398_v54 = vmul.f32 %v394_v55, %v390_v36  ;;  %v388_v7 = vmul.f32 %v384_v63, %v1138_v51  ;;  %v396_v8 = vsub.f32 1.0, %v384_v63  ;;  %vm1175_vm2 = vcmp.lt.f32.partialorder %v275_v14, 0.0004427343 }
  0x4f   : > { %v401_v62 = vadd.f32 %v397_v58, %v385_v49  ;;  %v399_v4 = vmul.f32 %v395_v19, %v391_v41  ;;  %v300_v48 = vadd.f32 1.0, %v299_v6  ;;  %v293_v49 = vand.u32 2147483647, %v1018_v18 }
  0x50   : > { %v402_v5 = vadd.f32 %v398_v54, %v386_v53  ;;  %v400_v33 = vmul.f32 %v396_v8, %v392_v20  ;;  %v302_v50 = vand.u32 2147483647, %v1026_v21  ;;  %v271_v38 = vmul.f32 0.6931472, %v717_v9 }
  0x51   : > { %v417_v22 = vsub.f32 1.0, %v401_v62  ;;  %v403_v11 = vadd.f32 %v399_v4, %v387_v60  ;;  %v274_v53 = vmul.f32 %v1014_v16, %v273_v15  ;;  %vm1186_vm4 = vcmp.lt.f32.partialorder %v284_v28, 0.0004427343 }
  0x52   : > { %v418_v12 = vsub.f32 1.0, %v402_v5  ;;  %v404_v45 = vadd.f32 %v400_v33, %v388_v7  ;;  %v280_v56 = vmul.f32 0.6931472, %v719_v13  ;;  %v283_v57 = vmul.f32 %v1016_v17, %v282_v37 }
  0x53   : > { %v1171_v39 = vmax.f32 %v417_v22, 0.0  ;;  %v419_v43 = vsub.f32 1.0, %v403_v11  ;;  %v292_v58 = vmul.f32 %v1018_v18, %v291_v40  ;;  %v289_v59 = vmul.f32 0.6931472, %v721_v46 }
  0x54   : > { %v1173_v44 = vmax.f32 %v418_v12, 0.0  ;;  %v420_v55 = vsub.f32 1.0, %v404_v45  ;;  %v298_v60 = vmul.f32 0.6931472, %v723_v42  ;;  %v301_v19 = vmul.f32 %v1026_v21, %v300_v48 }
  0x55   : > { %724 = vrsqrt.f32 %v1171_v39  ;;  %v1182_v52 = vmax.f32 %v419_v43, 0.0  ;;  %v265_v16 = vsub.f32 %v257_v27, %v1052_v31  ;;  %v266_v61 = vsub.f32 %v258_v29, %v1056_v32 }
  0x56   : > { %726 = vrsqrt.f32 %v1173_v44  ;;  %v1194_v54 = vmax.f32 %v420_v55, 0.0  ;;  %vm1202_vm6 = vcmp.lt.f32.partialorder %v293_v49, 0.0004427343  ;;  %vm1206_vm7 = vcmp.lt.f32.partialorder %v302_v50, 0.0004427343 }
  0x57   : > { %728 = vrsqrt.f32 %v1182_v52  ;;  %v267_v21 = vsub.f32 %v259_v30, %v263_v10  ;;  %v268_v0 = vsub.f32 %v260_v34, %v264_v23  ;;  %v277_v27 = vsel %vm1175_vm2, %v274_v53, %v271_v38 }
  0x58   : > { %730 = vrsqrt.f32 %v1194_v54  ;;  %v286_v29 = vsel %vm1186_vm4, %v283_v57, %v280_v56  ;;  %v405_v31 = vmul.f32 0.25, %v1037_v24  ;;  %v409_v32 = vmul.f32 0.75, %v389_v35 }
  0x59   : > { %v295_v3 = vsel %vm1202_vm6, %v292_v58, %v289_v59  ;;  %v304_v30 = vsel %vm1206_vm7, %v301_v19, %v298_v60  ;;  %v406_v34 = vmul.f32 0.25, %v1040_v25  ;;  %v407_v5 = vmul.f32 0.25, %v1044_v26 }
  0x5a   : > { %v408_v6 = vmul.f32 0.25, %v1138_v51  ;;  %v410_v24 = vmul.f32 0.75, %v390_v36  ;;  %v411_v7 = vmul.f32 0.75, %v391_v41  ;;  %v412_v8 = vmul.f32 0.75, %v392_v20 }
  0x5b   : > { %v725_v62 = vpop.eup %724  ;;  %v305_v10 = vadd.f32 %v277_v27, %v265_v16  ;;  %v413_v23 = vadd.f32 %v409_v32, %v405_v31  ;;  %v306_v13 = vadd.f32 %v286_v29, %v266_v61  ;;  %v307_v15 = vadd.f32 %v295_v3, %v267_v21 }
  0x5c   : > { %v727_v1 = vpop.eup %726  ;;  %v426_v2 = vmul.f32 %v725_v62, %v1171_v39  ;;  %v308_v25 = vadd.f32 %v304_v30, %v268_v0  ;;  %v414_v36 = vadd.f32 %v410_v24, %v406_v34  ;;  %v415_v41 = vadd.f32 %v411_v7, %v407_v5 }
  0x5d   : > { %v438_v63 = vmul.f32 %v727_v1, %v1173_v44  ;;  %v729_v4 = vpop.eup %728  ;;  %v416_v40 = vadd.f32 %v412_v8, %v408_v6  ;;  %vm432_vm8 = vcmp.eq.f32.partialorder %v1171_v39, inf  ;;  %v477_v47 = vmul.f32 %v413_v23, %v305_v10 }
  0x5e   : > { %v427_v35 = vmul.f32 %v725_v62, %v426_v2  ;;  %v450_v9 = vmul.f32 %v729_v4, %v1182_v52  ;;  %v731_v12 = vpop.eup %730  ;;  %vm434_vm9 = vcmp.eq.f32.partialorder %v1171_v39, 0.0  ;;  %v435_v48 = vand.u32 2147483648, %v1171_v39 }
  0x5f   : > { %v439_v22 = vmul.f32 %v727_v1, %v438_v63  ;;  %v462_v26 = vmul.f32 %v731_v12, %v1194_v54  ;;  %vm444_vm10 = vcmp.eq.f32.partialorder %v1173_v44, inf  ;;  %v447_v50 = vand.u32 2147483648, %v1173_v44 }
  0x60   : > { %v428_v11 = vmul.f32 0.5, %v427_v35  ;;  %v451_v33 = vmul.f32 %v729_v4, %v450_v9  ;;  %vm446_vm11 = vcmp.eq.f32.partialorder %v1173_v44, 0.0  ;;  %v478_v55 = vmul.f32 %v414_v36, %v306_v13 }
  0x61   : > { %v440_v28 = vmul.f32 0.5, %v439_v22  ;;  %v463_v46 = vmul.f32 %v731_v12, %v462_v26  ;;  %vm456_vm12 = vcmp.eq.f32.partialorder %v1182_v52, inf  ;;  %v459_v57 = vand.u32 2147483648, %v1182_v52 }
  0x62   : > { %v429_v37 = vsub.f32 1.5, %v428_v11  ;;  %v452_v20 = vmul.f32 0.5, %v451_v33  ;;  %vm458_vm13 = vcmp.eq.f32.partialorder %v1182_v52, 0.0  ;;  %v479_v18 = vmul.f32 %v415_v41, %v307_v15 }
  0x63   : > { %v441_v51 = vsub.f32 1.5, %v440_v28  ;;  %v464_v38 = vmul.f32 0.5, %v463_v46  ;;  %vm468_vm14 = vcmp.eq.f32.partialorder %v1194_v54, inf  ;;  %v471_v21 = vand.u32 2147483648, %v1194_v54 }
  0x64   : > { %v430_v43 = vmul.f32 %v725_v62, %v429_v37  ;;  %v453_v42 = vsub.f32 1.5, %v452_v20  ;;  %vm470_vm15 = vcmp.eq.f32.partialorder %v1194_v54, 0.0  ;;  %v480_v2 = vmul.f32 %v416_v40, %v308_v25 }
  0x65   : > { %v442_v45 = vmul.f32 %v727_v1, %v441_v51  ;;  %v465_v58 = vsub.f32 1.5, %v464_v38 }
  0x66   : > { %v431_v49 = vmul.f32 %v430_v43, %v1171_v39  ;;  %v454_v14 = vmul.f32 %v729_v4, %v453_v42 }
  0x67   : > { %v443_v53 = vmul.f32 %v442_v45, %v1173_v44  ;;  %v466_v61 = vmul.f32 %v731_v12, %v465_v58 }
  0x68   : > { %v433_v56 = vsel %vm432_vm8, %v1171_v39, %v431_v49  ;;  %v455_v19 = vmul.f32 %v454_v14, %v1182_v52 }
  0x69   : > { %v436_v59 = vsel %vm434_vm9, %v435_v48, %v433_v56  ;;  %v445_v60 = vsel %vm444_vm10, %v1173_v44, %v443_v53  ;;  %v467_v1 = vmul.f32 %v466_v61, %v1194_v54 }
  0x6a   : > { %v448_v16 = vsel %vm446_vm11, %v447_v50, %v445_v60  ;;  %v473_v17 = vmul.f32 %v436_v59, %v1171_v39  ;;  %v457_v62 = vsel %vm456_vm12, %v1182_v52, %v455_v19 }
  0x6b   : > { %v474_v0 = vmul.f32 %v448_v16, %v1173_v44  ;;  %v460_v27 = vsel %vm458_vm13, %v459_v57, %v457_v62  ;;  %v469_v39 = vsel %vm468_vm14, %v1194_v54, %v467_v1 }
  0x6c   : > { %v481_v29 = vmul.f32 %v477_v47, %v473_v17  ;;  %v475_v31 = vmul.f32 %v460_v27, %v1182_v52  ;;  %v472_v3 = vsel %vm470_vm15, %v471_v21, %v469_v39 }
  0x6d   : > { %v482_v32 = vmul.f32 %v478_v55, %v474_v0  ;;  %v476_v44 = vmul.f32 %v472_v3, %v1194_v54 }
  0x6e   : > { %v483_v30 = vmul.f32 %v479_v18, %v475_v31 }
  0x6f   : > { %v486_v34 = vadd.f32 %v482_v32, %v481_v29  ;;  %v484_v4 = vmul.f32 %v480_v2, %v476_v44 }
  0x71   : > { %v487_v63 = vadd.f32 %v486_v34, %v483_v30 }
  0x73   : > { %v488_v52 = vadd.f32 %v487_v63, %v484_v4 }
  0x75   : > { %490 = vst [vmem:[%s223_s16] sm:$0xff] %v488_v52 }
  0x76   : > { %819 = shalt.err (!%p816_p13)
}
  0x77   : > { %634 = dma.vmem_to_hbm [thread:$0]  (%p948_p9), %s505_s18, 128, %s507_s20, %s492_s12  }
  0x78 PF: > { %s518_s3 = sand.u32 1, %s858_s9   ;;  %p644_p0 = pnand %p613_p12, %p955_p11 }
  0x79   : > { %s519_s25 = scalar_lea.sflag [#allocation4], %s518_s3 }
  0x7a   : > { %p645_p1 = pneg %p644_p0 }
  0x7c   : > { %853 = dma.done.wait (%p645_p1), %s519_s25, 128  }
  0x7d   : > { %855 = vsyncadd (%p645_p1), %s519_s25, 4294967168  ;;  %s21_s14 = sadd.s32 1, %s878_s14   ;;  %s1332_s9 = smov %s862_s10 }
  0x7e   : > { %p18_p2 = scmp.ge.s32.totalorder %s21_s14, 4   ;;  %s1333_s10 = smov %s866_s11 }
  0x7f   : > { %s1334_s11 = smov %s953_s23  ;;  %s1335_s12 = smov %s874_s13 }
  0x80   : > { %s1336_s13 = smov %s1338_s17  ;;  %20 = sbr.rel (!%p18_p2) target bundleno = 8 (0x8), region = 90 }
  0x85   :  { %525 = vsyncpa [#allocation3], 1 }
  0x86   :  { %527 = vsyncpa [#allocation3 + $0x1], 1 }
  0x87   :  { %528 = vsyncpa [#allocation6], 1 }
  0x88   :  { %530 = vsyncpa [#allocation6 + $0x1], 1 }
  0x89   :  { %531 = vsyncpa [#allocation4], 1 }
  0x8a   :  { %533 = vsyncpa [#allocation4 + $0x1], 1 }

</bundles_post_ra>
